<compile_context>
chip_gen: v7x
topology: tpu7x:2x2x1
jax: 0.10.0
libtpu: 0.0.40
codegen_flags: <defaults>
</compile_context>

<pallas_src>
import jax
import jax.numpy as jnp
from jax.experimental import pallas as pl
from jax.experimental.pallas import tpu as pltpu


# ----------------------------- kernels ------------------------------------- #

def _pool_kv_kernel(x4_ref, wpg_ref, bpg_ref, phiT_ref, g_ref):
    """Fused phi/g 1x1-conv + 2x2 max-pool for one batch element.

    x4 rows are grouped by window-pixel index k (row = k*Ns + s), so conv-then-
    pool is one wide MXU matmul followed by a 4-way max over row groups (the
    per-channel bias commutes with the max).  phi is written pre-transposed.
    """
    ip = wpg_ref.shape[1] // 2
    ns = g_ref.shape[1]
    pg = jnp.dot(x4_ref[0], wpg_ref[...],
                 preferred_element_type=jnp.float32)               # (4*Ns, 2*Ip)
    m = jnp.maximum(jnp.maximum(pg[:ns], pg[ns:2 * ns]),
                    jnp.maximum(pg[2 * ns:3 * ns], pg[3 * ns:]))
    m = m + bpg_ref[...]                                           # (Ns, 2*Ip)
    phiT_ref[0] = m[:, :ip].T.astype(jnp.bfloat16)                 # pooled keys^T
    g_ref[0] = m[:, ip:].astype(jnp.bfloat16)                      # pooled values


def _make_attn_kernel(exp_in_bf16):
    def kernel(x_ref, phiT_ref, g_ref, wth_ref, bth_ref, ww_ref, bw_ref,
               scale_ref, shift_ref, out_ref):
        x = x_ref[0]                                               # (TQ, Cp) f32
        theta = jnp.dot(x.astype(jnp.bfloat16), wth_ref[...],
                        preferred_element_type=jnp.float32) + bth_ref[...]
        # attention scores against the pre-transposed pooled keys
        f = jnp.dot(theta.astype(jnp.bfloat16), phiT_ref[0],
                    preferred_element_type=jnp.float32)            # (TQ, Ns)
        f = f - jnp.max(f, axis=-1, keepdims=True)
        if exp_in_bf16:
            # v6e/v7x: bf16 EUP path (~2x exp throughput) and no extra cast pass.
            p = jnp.exp(f.astype(jnp.bfloat16))
        else:
            # v5e-class chips: no bf16 EUP; exp in f32, round once for the MXU.
            p = jnp.exp(f).astype(jnp.bfloat16)
        # Denominator accumulated in f32 from the same bf16-rounded p that feeds
        # the numerator matmul (numerator-consistent normalization).
        denom = jnp.sum(p.astype(jnp.float32), axis=-1, keepdims=True)   # (TQ, 1)
        y = jnp.dot(p, g_ref[0], preferred_element_type=jnp.float32)     # (TQ, Ip)
        y = y * pl.reciprocal(denom, approx=True)
        # W: 1x1 conv inter -> C, folded BatchNorm affine, residual add.
        w_y = jnp.dot(y.astype(jnp.bfloat16), ww_ref[...],
                      preferred_element_type=jnp.float32) + bw_ref[...]  # (TQ, Cp)
        w_y = w_y * scale_ref[...] + shift_ref[...]
        out_ref[0] = (w_y + x).astype(out_ref.dtype)
    return kernel


# ----------------------------- wrappers ------------------------------------ #

def _round_up(x, m):
    return ((x + m - 1) // m) * m


def _device_kind():
    try:
        return jax.devices()[0].device_kind.lower()
    except Exception:
        return ""


def nonlocal_block_nhwc(x_nhwc, params, eps=1e-5, tq=None):
    """NonLocalBlock forward on an NHWC activation; returns NHWC float32."""
    B, H, W, C = x_nhwc.shape
    inter = params["w_theta"].shape[1]
    N = H * W
    H2, W2 = H // 2, W // 2            # MaxPool2d(2,2) floors odd trailing row/col
    Ns = H2 * W2

    Cp = _round_up(C, 128)
    Ip = _round_up(inter, 128)

    kind = _device_kind()
    exp_in_bf16 = not any(v in kind for v in ("v2", "v3", "v4", "v5"))
    if "v7" in kind:                       # 64 MiB physical VMEM
        vmem_cap, tq_default = 56 * 1024 * 1024, 256
    elif ("v6" in kind) or ("v5" in kind):  # 128 MiB physical VMEM
        vmem_cap, tq_default = 100 * 1024 * 1024, 512
    else:                                   # unknown chip: conservative
        vmem_cap, tq_default = 56 * 1024 * 1024, 256
    if tq is None:
        tq = tq_default

    # Fixed query tile; N padded up to a multiple of TQ (padded rows are inert and
    # sliced off), so awkward H*W never falls back to TQ = N.
    TQ = _round_up(max(8, min(int(tq), N)), 8)
    Np = _round_up(N, TQ)
    NQ = Np // TQ

    # ---- layout plumbing: channels-last, zero-pad channels (inert) -----------
    xf = x_nhwc.astype(jnp.float32)
    if Cp != C:
        xf = jnp.pad(xf, ((0, 0), (0, 0), (0, 0), (0, Cp - C)))
    x_flat = xf.reshape(B, N, Cp)
    if Np != N:
        x_flat = jnp.pad(x_flat, ((0, 0), (0, Np - N), (0, 0)))
    x4 = xf[:, :2 * H2, :2 * W2, :].reshape(B, H2, 2, W2, 2, Cp)
    x4 = jnp.transpose(x4, (0, 2, 4, 1, 3, 5)).reshape(B, 4 * Ns, Cp)
    x4 = x4.astype(jnp.bfloat16)

    # ---- weights: lane-dense padding, phi & g fused, bf16 MXU operands -------
    def pad2(w, r, c):
        return jnp.pad(w, ((0, r - w.shape[0]), (0, c - w.shape[1])))

    def pad1(v, n):
        return jnp.pad(v, (0, n - v.shape[0]))

    w_theta = pad2(params["w_theta"], Cp, Ip).astype(jnp.bfloat16)
    b_theta = pad1(params["b_theta"], Ip).reshape(1, Ip).astype(jnp.float32)
    w_pg = jnp.concatenate([pad2(params["w_phi"], Cp, Ip),
                            pad2(params["w_g"], Cp, Ip)], axis=1).astype(jnp.bfloat16)
    b_pg = jnp.concatenate([pad1(params["b_phi"], Ip),
                            pad1(params["b_g"], Ip)]).reshape(1, 2 * Ip).astype(jnp.float32)
    w_w = pad2(params["w_w"], Ip, Cp).astype(jnp.bfloat16)
    b_w = pad1(params["b_w"], Cp).reshape(1, Cp).astype(jnp.float32)

    # Fold eval-mode BatchNorm into an affine scale/shift.
    scale = params["bn_gamma"] / jnp.sqrt(params["bn_var"] + eps)
    shift = params["bn_beta"] - params["bn_mean"] * scale
    scale = pad1(scale, Cp).reshape(1, Cp).astype(jnp.float32)
    shift = pad1(shift, Cp).reshape(1, Cp).astype(jnp.float32)

    # ---- stage 1: pooled keys/values, grid=(B,), megacore-parallel -----------
    pool_budget = (
        2 * 4 * Ns * Cp * 2            # x4 tile (bf16), double-buffered
        + 2 * Cp * 2 * Ip * 2          # fused phi/g weight (bf16), double-buffered
        + 6 * Ns * 2 * Ip * 4          # pg + max/transpose temporaries (f32)
        + 4 * Ns * Ip * 2 * 2)         # phi_T / g outputs (bf16), double-buffered
    pool_vmem = int(min(vmem_cap, max(16 << 20, pool_budget + (8 << 20))))

    phi_t, g_pool = pl.pallas_call(
        _pool_kv_kernel,
        out_shape=(jax.ShapeDtypeStruct((B, Ip, Ns), jnp.bfloat16),
                   jax.ShapeDtypeStruct((B, Ns, Ip), jnp.bfloat16)),
        grid_spec=pltpu.PrefetchScalarGridSpec(
            num_scalar_prefetch=0,
            grid=(B,),
            in_specs=[pl.BlockSpec((1, 4 * Ns, Cp), lambda b: (b, 0, 0)),
                      pl.BlockSpec((Cp, 2 * Ip), lambda b: (0, 0)),
                      pl.BlockSpec((1, 2 * Ip), lambda b: (0, 0))],
            out_specs=[pl.BlockSpec((1, Ip, Ns), lambda b: (b, 0, 0)),
                       pl.BlockSpec((1, Ns, Ip), lambda b: (b, 0, 0))]),
        compiler_params=pltpu.CompilerParams(
            dimension_semantics=("parallel",),
            vmem_limit_bytes=pool_vmem),
    )(x4, w_pg, b_pg)

    # ---- stage 2: query-tiled attention, grid=(B, NQ), both axes parallel ----
    budget = (
        4 * TQ * Cp * 4                    # x + out tiles (f32), double-buffered
        + 4 * Ns * Ip * 2                  # phi_T + g (bf16), double-buffered
        + 4 * Cp * Ip * 2                  # w_theta + w_w (bf16), double-buffered
        + 2 * TQ * Ns * 4 + TQ * Ns * 2    # f (f32) + p (bf16) temporaries
        + 8 * TQ * max(Ip, Cp) * 4)        # theta / y / w_y temporaries
    vmem_limit = int(min(vmem_cap, max(16 << 20, budget + (8 << 20))))

    full2 = lambda b, q: (0, 0)
    out = pl.pallas_call(
        _make_attn_kernel(exp_in_bf16),
        out_shape=jax.ShapeDtypeStruct((B, Np, Cp), jnp.float32),
        grid_spec=pltpu.PrefetchScalarGridSpec(
            num_scalar_prefetch=0,
            grid=(B, NQ),
            in_specs=[
                pl.BlockSpec((1, TQ, Cp), lambda b, q: (b, q, 0)),
                pl.BlockSpec((1, Ip, Ns), lambda b, q: (b, 0, 0)),
                pl.BlockSpec((1, Ns, Ip), lambda b, q: (b, 0, 0)),
                pl.BlockSpec((Cp, Ip), full2),
                pl.BlockSpec((1, Ip), full2),
                pl.BlockSpec((Ip, Cp), full2),
                pl.BlockSpec((1, Cp), full2),
                pl.BlockSpec((1, Cp), full2),
                pl.BlockSpec((1, Cp), full2),
            ],
            out_specs=pl.BlockSpec((1, TQ, Cp), lambda b, q: (b, q, 0))),
        compiler_params=pltpu.CompilerParams(
            # No cross-step scratch dependency any more -> both grid axes can be
            # sharded across TensorCores (v7x megacore even at B == 1).
            dimension_semantics=("parallel", "parallel"),
            vmem_limit_bytes=vmem_limit),
    )(x_flat, phi_t, g_pool, w_theta, b_theta, w_w, b_w, scale, shift)

    return out[:, :N, :C].reshape(B, H, W, C)


def nonlocal_block(x_nchw, params, eps=1e-5, tq=None):
    """NCHW wrapper matching the PyTorch module interface."""
    x_nhwc = jnp.transpose(x_nchw, (0, 2, 3, 1))
    out = nonlocal_block_nhwc(x_nhwc, params, eps=eps, tq=tq)
    return jnp.transpose(out, (0, 3, 1, 2)).astype(x_nchw.dtype)


# ----------------------------- reference / test ---------------------------- #

def nonlocal_ref(x, params, eps=1e-5):
    """Pure-JAX f32 reference mirroring the PyTorch forward (NCHW)."""
    B, C, H, W = x.shape
    inter = params["w_theta"].shape[1]

    def conv1x1(t, w, b):
        return jnp.einsum("bchw,co->bohw", t, w) + b[None, :, None, None]

    def pool(t):
        b_, c_, h_, w_ = t.shape
        t = t[:, :, :2 * (h_ // 2), :2 * (w_ // 2)]
        return t.reshape(b_, c_, h_ // 2, 2, w_ // 2, 2).max(axis=(3, 5))

    g = pool(conv1x1(x, params["w_g"], params["b_g"]))
    phi = pool(conv1x1(x, params["w_phi"], params["b_phi"]))
    theta = conv1x1(x, params["w_theta"], params["b_theta"])

    g_x = g.reshape(B, inter, -1).transpose(0, 2, 1)
    theta_x = theta.reshape(B, inter, -1).transpose(0, 2, 1)
    phi_x = phi.reshape(B, inter, -1)

    f = jnp.einsum("bnc,bcm->bnm", theta_x, phi_x)
    f = jax.nn.softmax(f, axis=-1)
    y = jnp.einsum("bnm,bmc->bnc", f, g_x)
    y = y.transpose(0, 2, 1).reshape(B, inter, H, W)

    w_y = conv1x1(y, params["w_w"], params["b_w"])
    scale = params["bn_gamma"] / jnp.sqrt(params["bn_var"] + eps)
    shift = params["bn_beta"] - params["bn_mean"] * scale
    w_y = w_y * scale[None, :, None, None] + shift[None, :, None, None]
    return w_y + x


def make_params(key, in_channels, inter_channels):
    ks = jax.random.split(key, 8)

    def w(k, ci, co):
        return (jax.random.normal(k, (ci, co), jnp.float32) / jnp.sqrt(ci)).astype(jnp.float32)

    C, I = in_channels, inter_channels
    return {
        "w_g": w(ks[0], C, I), "b_g": jax.random.normal(ks[1], (I,), jnp.float32) * 0.1,
        "w_theta": w(ks[2], C, I), "b_theta": jax.random.normal(ks[3], (I,), jnp.float32) * 0.1,
        "w_phi": w(ks[4], C, I), "b_phi": jax.random.normal(ks[5], (I,), jnp.float32) * 0.1,
        "w_w": w(ks[6], I, C), "b_w": jax.random.normal(ks[7], (C,), jnp.float32) * 0.1,
        # Faithful to nn.init.constant_(W[1].weight, 0) / (W[1].bias, 0):
        "bn_gamma": jnp.zeros((C,), jnp.float32),
        "bn_beta": jnp.zeros((C,), jnp.float32),
        "bn_mean": jnp.zeros((C,), jnp.float32),
        "bn_var": jnp.ones((C,), jnp.float32),
    }


if __name__ == "__main__":
    B, C, H, W = 2, 4, 16, 16
    inter = C // 2

    key = jax.random.PRNGKey(0)
    kx, kp = jax.random.split(key)
    x = jax.random.normal(kx, (B, C, H, W), jnp.float32)
    params = make_params(kp, C, inter)

    # tq=64 -> 4 query tiles per batch element: exercises the tiled grid and the
    # per-batch pooled-key/value reuse across query tiles.
    z = jax.block_until_ready(nonlocal_block(x, params, tq=64))
    z_ref = nonlocal_ref(x, params)
    # Faithful init (BN gamma = beta = 0) makes z == x exactly.
    assert jnp.allclose(z, z_ref, atol=1e-5, rtol=1e-5), "mismatch (faithful init)"

    # Full attention + W path (gamma = 1), tq=96 so N=256 is padded to 288 and the
    # ragged last query tile is exercised.  bf16 MXU operands / bf16 exp (where
    # available) and the approximate reciprocal widen the tolerance vs pure f32.
    params_chk = dict(params, bn_gamma=jnp.ones((C,), jnp.float32))
    z2 = jax.block_until_ready(nonlocal_block(x, params_chk, tq=96))
    z2_ref = nonlocal_ref(x, params_chk)
    err = jnp.abs(z2 - z2_ref)
    assert bool(jnp.all(err <= 1e-1 + 1e-1 * jnp.abs(z2_ref))), "mismatch (full path)"
    assert float(jnp.mean(err)) < 3e-2, "mean error too large (full path)"

    print("KERNEL_OK")
</pallas_src>

<mosaic_0001>
module attributes {stable_mosaic.version = 11 : i64} {
  func.func @_pool_kv_kernel(%arg0: i32, %arg1: memref<1x256x128xbf16, #tpu.memory_space<vmem>>, %arg2: memref<128x256xbf16, #tpu.memory_space<vmem>>, %arg3: memref<1x256xf32, #tpu.memory_space<vmem>>, %arg4: memref<1x128x64xbf16, #tpu.memory_space<vmem>>, %arg5: memref<1x64x128xbf16, #tpu.memory_space<vmem>>) attributes {dimension_semantics = [#tpu.dimension_semantics<parallel>], iteration_bounds = array<i64: 2>, scalar_prefetch = 0 : i64, scratch_operands = 0 : i64, tpu.core_type = #tpu.core_type<tc>, window_params = [{transform_indices = @transform_0, window_bounds = array<i64: 1, 256, 128>}, {pipeline_mode = #tpu.pipeline_mode<synchronous>, transform_indices = @transform_1, window_bounds = array<i64: 128, 256>}, {pipeline_mode = #tpu.pipeline_mode<synchronous>, transform_indices = @transform_2, window_bounds = array<i64: 1, 256>}, {transform_indices = @transform_3, window_bounds = array<i64: 1, 128, 64>}, {transform_indices = @transform_4, window_bounds = array<i64: 1, 64, 128>}]} {
    %c0 = arith.constant 0 : index
    %c0_0 = arith.constant 0 : index
    %c0_1 = arith.constant 0 : index
    %0 = vector.load %arg1[%c0, %c0_0, %c0_1] : memref<1x256x128xbf16, #tpu.memory_space<vmem>>, vector<1x256x128xbf16>
    %1 = vector.shape_cast %0 : vector<1x256x128xbf16> to vector<256x128xbf16>
    %c0_2 = arith.constant 0 : index
    %c0_3 = arith.constant 0 : index
    %2 = vector.load %arg2[%c0_2, %c0_3] : memref<128x256xbf16, #tpu.memory_space<vmem>>, vector<128x256xbf16>
    %cst = arith.constant dense<0.000000e+00> : vector<256x256xf32>
    %3 = tpu.matmul %1, %2, %cst {dimension_numbers = #tpu.dot_dimension_numbers<[1], [0], [0], [1], [0, 0, 1, 1], [], []>} : vector<256x128xbf16>, vector<128x256xbf16>, vector<256x256xf32> -> vector<256x256xf32>
    %4 = vector.extract_strided_slice %3 {offsets = [0, 0], sizes = [64, 256], strides = [1, 1]} : vector<256x256xf32> to vector<64x256xf32>
    %5 = vector.extract_strided_slice %3 {offsets = [64, 0], sizes = [64, 256], strides = [1, 1]} : vector<256x256xf32> to vector<64x256xf32>
    %6 = arith.maximumf %4, %5 : vector<64x256xf32>
    %7 = vector.extract_strided_slice %3 {offsets = [128, 0], sizes = [64, 256], strides = [1, 1]} : vector<256x256xf32> to vector<64x256xf32>
    %8 = vector.extract_strided_slice %3 {offsets = [192, 0], sizes = [64, 256], strides = [1, 1]} : vector<256x256xf32> to vector<64x256xf32>
    %9 = arith.maximumf %7, %8 : vector<64x256xf32>
    %10 = arith.maximumf %6, %9 : vector<64x256xf32>
    %c0_4 = arith.constant 0 : index
    %c0_5 = arith.constant 0 : index
    %11 = vector.load %arg3[%c0_4, %c0_5] : memref<1x256xf32, #tpu.memory_space<vmem>>, vector<1x256xf32>
    %12 = vector.broadcast %11 : vector<1x256xf32> to vector<64x256xf32>
    %13 = arith.addf %10, %12 : vector<64x256xf32>
    %14 = vector.extract_strided_slice %13 {offsets = [0, 0], sizes = [64, 128], strides = [1, 1]} : vector<64x256xf32> to vector<64x128xf32>
    %15 = tpu.transpose %14, [1, 0] : vector<64x128xf32> -> vector<128x64xf32>
    %16 = arith.truncf %15 : vector<128x64xf32> to vector<128x64xbf16>
    %c0_6 = arith.constant 0 : index
    %c0_7 = arith.constant 0 : index
    %c0_8 = arith.constant 0 : index
    %17 = vector.load %arg4[%c0_6, %c0_7, %c0_8] : memref<1x128x64xbf16, #tpu.memory_space<vmem>>, vector<1x128x64xbf16>
    %18 = vector.shape_cast %17 : vector<1x128x64xbf16> to vector<128x64xbf16>
    %19 = vector.shape_cast %16 : vector<128x64xbf16> to vector<1x128x64xbf16>
    tpu.vector_store %arg4[%c0_6, %c0_7, %c0_8], %19 {strides = array<i32>} : memref<1x128x64xbf16, #tpu.memory_space<vmem>>, vector<1x128x64xbf16>,
    %20 = vector.extract_strided_slice %13 {offsets = [0, 128], sizes = [64, 128], strides = [1, 1]} : vector<64x256xf32> to vector<64x128xf32>
    %21 = arith.truncf %20 : vector<64x128xf32> to vector<64x128xbf16>
    %c0_9 = arith.constant 0 : index
    %c0_10 = arith.constant 0 : index
    %c0_11 = arith.constant 0 : index
    %22 = vector.load %arg5[%c0_9, %c0_10, %c0_11] : memref<1x64x128xbf16, #tpu.memory_space<vmem>>, vector<1x64x128xbf16>
    %23 = vector.shape_cast %22 : vector<1x64x128xbf16> to vector<64x128xbf16>
    %24 = vector.shape_cast %21 : vector<64x128xbf16> to vector<1x64x128xbf16>
    tpu.vector_store %arg5[%c0_9, %c0_10, %c0_11], %24 {strides = array<i32>} : memref<1x64x128xbf16, #tpu.memory_space<vmem>>, vector<1x64x128xbf16>,
    return
  }
  func.func @transform_0(%arg0: i32) -> (i32, i32, i32) {
    %c0_i32 = arith.constant 0 : i32
    %c0_i32_0 = arith.constant 0 : i32
    %c0_i32_1 = arith.constant 0 : i32
    return %arg0, %c0_i32, %c0_i32_0 : i32, i32, i32
  }
  func.func @transform_1(%arg0: i32) -> (i32, i32) {
    %c0_i32 = arith.constant 0 : i32
    %c0_i32_0 = arith.constant 0 : i32
    %c0_i32_1 = arith.constant 0 : i32
    return %c0_i32, %c0_i32_0 : i32, i32
  }
  func.func @transform_2(%arg0: i32) -> (i32, i32) {
    %c0_i32 = arith.constant 0 : i32
    %c0_i32_0 = arith.constant 0 : i32
    %c0_i32_1 = arith.constant 0 : i32
    return %c0_i32, %c0_i32_0 : i32, i32
  }
  func.func @transform_3(%arg0: i32) -> (i32, i32, i32) {
    %c0_i32 = arith.constant 0 : i32
    %c0_i32_0 = arith.constant 0 : i32
    %c0_i32_1 = arith.constant 0 : i32
    return %arg0, %c0_i32, %c0_i32_0 : i32, i32, i32
  }
  func.func @transform_4(%arg0: i32) -> (i32, i32, i32) {
    %c0_i32 = arith.constant 0 : i32
    %c0_i32_0 = arith.constant 0 : i32
    %c0_i32_1 = arith.constant 0 : i32
    return %arg0, %c0_i32, %c0_i32_0 : i32, i32, i32
  }
}

</mosaic_0001>

<bundles_post_ra>
// kernel: tpu_custom_call.1
= control target key start
LH: loop header
LB: loop body
LE: loop exit
PB: predicated region body
PF: predicated region fallthrough
CT: control target
= control target key end

     0   :  { %10 = vsyncpa [#allocation3], 0  ;;  %s1808_s0 = inlined_call_operand.hbm [shape: bf16[2,256,128], index: 0, kind: input, shape index: {}]   ;;  %s1809_s1 = inlined_call_operand.hbm [shape: bf16[128,256], index: 1, kind: input, shape index: {}]   ;;  %s1810_s2 = inlined_call_operand.vmem [shape: f32[1,256], index: 2, kind: input, shape index: {}]   ;;  %s1811_s3 = inlined_call_operand.vmem [shape: bf16[2,128,64], index: 3, kind: output, shape index: {0}]   ;;  %s1812_s4 = inlined_call_operand.hbm [shape: bf16[2,64,128], index: 4, kind: output, shape index: {1}]  }
   0x1   :  { %12 = vsyncpa [#allocation3 + $0x1], 0 }
   0x2   :  { %13 = vsyncpa [#allocation6], 0 }
   0x3   :  { %14 = vsyncpa [#allocation4], 0 }
   0x4   :  { %16 = vsyncpa [#allocation4 + $0x1], 0  ;;  %s1431_s15 = smov 0   ;;  %s1433_s16 = smov 0  }
   0x5   :  { %s1435_s17 = smov 0   ;;  %s1437_s18 = smov 0  }
   0x6 LB: > { %s1452_s19 = sadd.s32 4294967295, %s1394_s18   ;;  %s1021_s20 = sadd.s32 4294967294, %s1394_s18   ;;  %s1394_s18 = sphi %s1437_s18, %s1832_s18   ;;  %s1390_s17 = sphi %s1435_s17, %s1831_s17   ;;  %s1386_s16 = sphi %s1433_s16, %s1830_s16   ;;  %s1382_s15 = sphi %s1431_s15, %s1829_s15  }
   0x7   : > { %p42_p0 = scmp.ne.s32.totalorder %s1386_s16, %s1382_s15  ;;  %p1813_p1 = scmp.eq.s32.totalorder %s1452_s19, 0 }
   0x8   : > { %p140_p3 = scmp.eq.s32.totalorder %s1021_s20, 1  ;;  %p1022_p5 = scmp.ge.s32.totalorder %s1394_s18, 1 }
   0x9   : > { %p1461_p4 = por %p1813_p1, %p42_p0  ;;  %p147_p7 = scmp.lt.s32.totalorder %s1394_s18, 3 }
   0xa   : > { %p1466_p6 = por %p140_p3, %p42_p0  ;;  %s1396_s24 = smov [#allocation5]  }
   0xb   : > { %s1816_s21 = scalar_select %p1461_p4, 1, 0 }
   0xc   : > { %s1817_s22 = scalar_select %p1466_p6, 1, 0 }
   0xd   : > { %p1471_p8 = pnand %p1022_p5, %p147_p7  ;;  %s159_s25 = sshll.u32 %s1396_s24, 4  ;;  %s1475_s25 = int_to_ptr.vmem [resolvable:$true] %s159_s25 }
   0xe   : > { %s1487_s27 = sadd.s32 1, %s1394_s18   ;;  %s29_s28 = sadd.s32 1, %s1390_s17 }
   0xf   : > { %s1818_s23 = scalar_select %p1471_p8, 1, 0 }
  0x10   : > { %p1169_p9 = pneg %p1471_p8  ;;  %s26_s29 = ssub.s32 %s1394_s18, %s1487_s27 }
  0x11   : > { %s1266_s6 = scalar_lea.hbm %s1809_s1, 2048 }
  0x12   : > { %p1482_p11 = pnand %p1169_p9, %p1813_p1  ;;  %p1267_p12 = scmp.ne.s32.totalorder %s1809_s1, %s1266_s6 }
  0x13   : > { %p1273_p5 = scmp.lt.u32.totalorder %s1266_s6, %s1809_s1 }
  0x14   : > { %p1268_p13 = pneg %p1482_p11 }
  0x16   : > { %p1269_p0 = pnand %p1268_p13, %p1267_p12 }
  0x18   : > { %p1270_p3 = pneg %p1269_p0 }
  0x1a   : > { %p1275_p7 = pnand %p1273_p5, %p1270_p3 }
  0x1c   : > { %1278 = shalt.err (!%p1275_p7)
}
  0x1d   : > { %s1279_s11 = scalar_lea.vmem %s1475_s25, 2048  ;;  %p1287_p2 = scmp.lt.s32.totalorder %s1475_s25, %s1475_s25 }
  0x1e   : > { %p1280_p9 = scmp.ne.s32.totalorder %s1475_s25, %s1279_s11  ;;  %p1288_p6 = scmp.lt.s32.totalorder %s1279_s11, %s1279_s11 }
  0x20   : > { %p1282_p10 = pnand %p1280_p9, %p1268_p13  ;;  %p1289_p4 = por %p1288_p6, %p1287_p2 }
  0x22   : > { %p1283_p1 = pneg %p1282_p10 }
  0x24   : > { %p1290_p8 = pnand %p1289_p4, %p1283_p1 }
  0x26   : > { %1293 = shalt.err (!%p1290_p8)
}
  0x27   : > { %s1397_s12 = smov 128   ;;  %s1398_s13 = smov 8  }
  0x28   : > { %1172 = dma.hbm_to_vmem [thread:$0]  (!%p1482_p11), %s1809_s1, 2048, %s1475_s25, [#allocation6], %s1397_s12, %s1397_s12, %s1398_s13  }
  0x29   : > { %p27_p2 = scmp.eq.s32.totalorder %s26_s29, 0  ;;  %p36_p1 = scmp.ne.s32.totalorder %s1390_s17, %s1386_s16 }
  0x2a   : > { %p37_p4 = scmp.eq.s32.totalorder %s1394_s18, 0  ;;  %p1182_p6 = scmp.lt.s32.totalorder %s1394_s18, 2 }
  0x2b   : > { %s1518_s24 = scalar_select %p27_p2, %s1390_s17, %s29_s28  }
  0x2c   : > { %p38_p8 = por %p37_p4, %p36_p1  ;;  %p1820_p10 = scmp.eq.s32.totalorder %s1452_s19, 1 }
  0x2d   : > { %s176_s5 = sand.u32 1, %s1390_s17   ;;  %s1095_s6 = sshll.u32 %s1394_s18, 11 }
  0x2e   : > { %p1522_p12 = por %p1820_p10, %p36_p1  ;;  %s1025_s7 = sshll.u32 %s176_s5, 7 }
  0x2f   : > { %s1531_s9 = scalar_lea.hbm %s1808_s0, %s1095_s6  ;;  %s180_s25 = scalar_lea.vmem [#allocation2], %s1025_s7 }
  0x30   : > { %s187_s28 = sshll.u32 %s180_s25, 4  ;;  %p1533_p11 = pnand %p1182_p6, %p38_p8  ;;  %s1537_s28 = int_to_ptr.vmem [resolvable:$true] %s187_s28 }
  0x31   : > { %s1539_s10 = scalar_lea.sflag [#allocation3], %s176_s5  ;;  %s1294_s11 = scalar_lea.hbm %s1531_s9, 2048 }
  0x32   : > { %p1295_p13 = scmp.ne.s32.totalorder %s1531_s9, %s1294_s11  ;;  %p1296_p0 = pneg %p1533_p11 }
  0x33   : > { %s1299_s14 = scalar_lea.hbm %s1808_s0, 4096  ;;  %p1300_p7 = scmp.lt.u32.totalorder %s1531_s9, %s1808_s0 }
  0x34   : > { %p1297_p3 = pnand %p1296_p0, %p1295_p13  ;;  %p1301_p9 = scmp.lt.u32.totalorder %s1299_s14, %s1294_s11 }
  0x35   : > { %p1303_p1 = scmp.lt.u32.totalorder %s1294_s11, %s1531_s9 }
  0x36   : > { %p1298_p5 = pneg %p1297_p3  ;;  %p1302_p2 = por %p1301_p9, %p1300_p7 }
  0x38   : > { %p1304_p4 = por %p1303_p1, %p1302_p2 }
  0x3a   : > { %p1305_p6 = pnand %p1304_p4, %p1298_p5 }
  0x3c   : > { %1308 = shalt.err (!%p1305_p6)
}
  0x3d   : > { %s1309_s5 = scalar_lea.vmem %s1537_s28, 2048  ;;  %s1399_s7 = smov [#allocation2]  }
  0x3e   : > { %p1310_p8 = scmp.ne.s32.totalorder %s1537_s28, %s1309_s5  ;;  %s1314_s26 = sshll.u32 %s1399_s7, 4  ;;  %s1315_s26 = int_to_ptr.vmem [resolvable:$false] %s1314_s26 }
  0x3f   : > { %s1316_s8 = scalar_lea.vmem %s1315_s26, 4096  ;;  %p1317_p3 = scmp.lt.s32.totalorder %s1537_s28, %s1315_s26 }
  0x40   : > { %p1312_p10 = pnand %p1310_p8, %p1296_p0  ;;  %p1318_p7 = scmp.lt.s32.totalorder %s1316_s8, %s1309_s5 }
  0x42   : > { %p1313_p13 = pneg %p1312_p10  ;;  %p1319_p9 = por %p1318_p7, %p1317_p3 }
  0x44   : > { %p1320_p2 = pnand %p1319_p9, %p1313_p13 }
  0x46   : > { %1323 = shalt.err (!%p1320_p2)
}
  0x47   : > { %s1400_s25 = smov 64   ;;  %s1401_s11 = smov 4  }
  0x48   : > { %1176 = dma.hbm_to_vmem [thread:$0]  (!%p1533_p11), %s1531_s9, 2048, %s1537_s28, %s1539_s10, %s1400_s25, %s1400_s25, %s1401_s11  }
  0x49   : > { %p1823_p0 = scmp.ne.s32.totalorder %s1818_s23, 0 }
  0x4a   : > { %s1570_s12 = sand.u32 (!%p1823_p0), 1, %s1386_s16   ;;  %p1824_p5 = scmp.ne.s32.totalorder (!%p1823_p0), %s1816_s21, 0 }
  0x4b   : > { %199 = sbr.rel (%p1823_p0) target bundleno = 562 (0x232), region = 32  ;;  %s1029_s13 = sshll.u32 (!%p1823_p0), %s1570_s12, 7 }
  0x4c   : > { %s202_s14 = scalar_lea.sflag (!%p1823_p0), [#allocation3], %s1570_s12  ;;  %s1574_s20 = scalar_lea.vmem (!%p1823_p0), [#allocation2], %s1029_s13 }
  0x52   : > { %1369 = dma.done.wait (%p1824_p5), %s202_s14, 2048  }
  0x53   : > { %1371 = vsyncadd (%p1824_p5), %s202_s14, 4294965248  ;;  %p1825_p11 = scmp.eq.s32.totalorder %s1452_s19, 0 }
  0x55   : > { %1373 = dma.done.wait (%p1825_p11), [#allocation6], 2048   ;;  %p1826_p1 = pmov %p1825_p11 }
  0x56   : > { %v1402_v0 = vmov 0   ;;  %v1226_v1 = vld [vmem:[#allocation5 + $0x4] ss:$8 sps:$4 sm:$0xff]   ;;  %v1228_v2 = vld [vmem:[#allocation5] ss:$8 sps:$4 sm:$0xff]   ;;  %v1254_v21 = vld [vmem:[%s1574_s20 + $0x10] sm:$0xff]   ;;  %v712_v57 = vlaneseq }
  0x57   : > { %1375 = vsyncadd (%p1826_p1), [#allocation6], 4294965248  ;;  %501 = vmatprep.mubr.bf16.mxu0 %v1402_v0  ;;  %581 = vmatprep.mubr.bf16.mxu1 %v1402_v0  ;;  %v1229_v3 = vld [vmem:[#allocation5 + $0x14] ss:$8 sps:$4 sm:$0xff]   ;;  %v1231_v4 = vld [vmem:[#allocation5 + $0x10] ss:$8 sps:$4 sm:$0xff]  }
  0x58   : > { %469 = vmatprep.subr.bf16.mxu0 %v1226_v1  ;;  %1145 = vmatprep.subr.bf16.mxu1 %v1226_v1  ;;  %v1232_v5 = vld [vmem:[#allocation5 + $0x24] ss:$8 sps:$4 sm:$0xff]   ;;  %v1234_v6 = vld [vmem:[#allocation5 + $0x20] ss:$8 sps:$4 sm:$0xff]   ;;  %v1235_v7 = vld [vmem:[#allocation5 + $0x34] ss:$8 sps:$4 sm:$0xff]  }
  0x59   : > { %470 = vmatpush1.bf16.msra.mxu0 %v1228_v2  ;;  %1153 = vmatpush1.bf16.msra.mxu1 %v1228_v2  ;;  %v1237_v8 = vld [vmem:[#allocation5 + $0x30] ss:$8 sps:$4 sm:$0xff]   ;;  %v1238_v9 = vld [vmem:[#allocation5 + $0x44] ss:$8 sps:$4 sm:$0xff]   ;;  %v1240_v10 = vld [vmem:[#allocation5 + $0x40] ss:$8 sps:$4 sm:$0xff]  }
  0x5a   : > { %471 = vmatprep.subr.bf16.mxu0 %v1229_v3  ;;  %1146 = vmatprep.subr.bf16.mxu1 %v1229_v3  ;;  %v1241_v11 = vld [vmem:[#allocation5 + $0x54] ss:$8 sps:$4 sm:$0xff]   ;;  %v1243_v12 = vld [vmem:[#allocation5 + $0x50] ss:$8 sps:$4 sm:$0xff]   ;;  %v1244_v13 = vld [vmem:[#allocation5 + $0x64] ss:$8 sps:$4 sm:$0xff]  }
  0x5b   : > { %v1246_v14 = vld [vmem:[#allocation5 + $0x60] ss:$8 sps:$4 sm:$0xff]   ;;  %v1247_v15 = vld [vmem:[#allocation5 + $0x74] ss:$8 sps:$4 sm:$0xff]   ;;  %v1249_v16 = vld [vmem:[#allocation5 + $0x70] ss:$8 sps:$4 sm:$0xff]  }
  0x5c   : > { %v1250_v17 = vld [vmem:[%s1574_s20] sm:$0xff]   ;;  %v1252_v19 = vld [vmem:[%s1574_s20 + $0x8] sm:$0xff]   ;;  %v1255_v22 = vld [vmem:[%s1574_s20 + $0x50] sm:$0xff]   ;;  %v713_v62 = vshrl.u32 %v712_v57, 7  ;;  %s1031_s9 = sshll.u32 %s1570_s12, 5  ;;  %s1121_s10 = sshll.u32 %s1452_s19, 9 }
  0x5d   : > { %472 = vmatpush1.bf16.msra.mxu0 %v1231_v4  ;;  %1154 = vmatpush1.bf16.msra.mxu1 %v1231_v4  ;;  %v1251_v18 = vld [vmem:[%s1574_s20 + $0x40] sm:$0xff]   ;;  %v1253_v20 = vld [vmem:[%s1574_s20 + $0x48] sm:$0xff]   ;;  %v1256_v23 = vld [vmem:[%s1574_s20 + $0x18] sm:$0xff]   ;;  %s1682_s28 = scalar_lea.vmem [#allocation7], %s1031_s9  ;;  %s1725_s7 = scalar_lea.hbm %s1812_s4, %s1121_s10 }
  0x5e   : > { %473 = vmatprep.subr.bf16.mxu0 %v1232_v5  ;;  %1147 = vmatprep.subr.bf16.mxu1 %v1232_v5  ;;  %v1257_v24 = vld [vmem:[%s1574_s20 + $0x58] sm:$0xff]   ;;  %v1258_v25 = vld [vmem:[%s1574_s20 + $0x20] sm:$0xff]   ;;  %v1260_v27 = vld [vmem:[%s1574_s20 + $0x28] sm:$0xff]   ;;  %v714_v3 = vsub.s32 0, %v713_v62  ;;  %s913_s29 = sshll.u32 %s1682_s28, 4  ;;  %s897_s26 = scalar_lea.sflag [#allocation4], %s1570_s12  ;;  %s1719_s29 = int_to_ptr.vmem [resolvable:$true] %s913_s29 }
  0x5f   : > { %v1259_v26 = vld [vmem:[%s1574_s20 + $0x60] sm:$0xff]   ;;  %v1261_v28 = vld [vmem:[%s1574_s20 + $0x68] sm:$0xff]   ;;  %v1262_v29 = vld [vmem:[%s1574_s20 + $0x30] sm:$0xff]   ;;  %s1324_s8 = scalar_lea.vmem %s1719_s29, 512  ;;  %s1403_s25 = smov [#allocation7]  }
  0x60   : > { %v1263_v30 = vld [vmem:[%s1574_s20 + $0x70] sm:$0xff]   ;;  %v1264_v31 = vld [vmem:[%s1574_s20 + $0x38] sm:$0xff]   ;;  %v710_v4 = vld [vmem:[%s1810_s2] sm:$0x3]  ;;  %p1325_p4 = scmp.ne.s32.totalorder %s1719_s29, %s1324_s8  ;;  %s1328_s11 = sshll.u32 %s1403_s25, 4  ;;  %s1329_s11 = int_to_ptr.vmem [resolvable:$false] %s1328_s11 }
  0x61   : > { %474 = vmatpush1.bf16.msra.mxu0 %v1234_v6  ;;  %1155 = vmatpush1.bf16.msra.mxu1 %v1234_v6  ;;  %v1265_v32 = vld [vmem:[%s1574_s20 + $0x78] sm:$0xff]   ;;  %s1330_s13 = scalar_lea.vmem %s1329_s11, 1024  ;;  %p1331_p10 = scmp.lt.s32.totalorder %s1719_s29, %s1329_s11 }
  0x62   : > { %475 = vmatprep.subr.bf16.mxu0 %v1235_v7  ;;  %1148 = vmatprep.subr.bf16.mxu1 %v1235_v7  ;;  %v718_v7 = vsub.s32 1, %v713_v62  ;;  %p1326_p6 = pnand %p1325_p4, %p1522_p12  ;;  %p1332_p13 = scmp.lt.s32.totalorder %s1330_s13, %s1324_s8 }
  0x64   : > { %p1327_p8 = pneg %p1326_p6  ;;  %p1333_p3 = por %p1332_p13, %p1331_p10 }
  0x65   : > { %476 = vmatpush1.bf16.msra.mxu0 %v1237_v8  ;;  %1156 = vmatpush1.bf16.msra.mxu1 %v1237_v8 }
  0x66   : > { %477 = vmatprep.subr.bf16.mxu0 %v1238_v9  ;;  %1149 = vmatprep.subr.bf16.mxu1 %v1238_v9  ;;  %p1334_p7 = pnand %p1333_p3, %p1327_p8 }
  0x69   : > { %478 = vmatpush1.bf16.msra.mxu0 %v1240_v10  ;;  %1157 = vmatpush1.bf16.msra.mxu1 %v1240_v10 }
  0x6a   : > { %479 = vmatprep.subr.bf16.mxu0 %v1241_v11  ;;  %1150 = vmatprep.subr.bf16.mxu1 %v1241_v11 }
  0x6d   : > { %480 = vmatpush1.bf16.msra.mxu0 %v1243_v12  ;;  %1158 = vmatpush1.bf16.msra.mxu1 %v1243_v12  ;;  %v1667_v12 = vrot.slane %v710_v4, %v714_v3 }
  0x6e   : > { %481 = vmatprep.subr.bf16.mxu0 %v1244_v13  ;;  %1151 = vmatprep.subr.bf16.mxu1 %v1244_v13 }
  0x71   : > { %482 = vmatpush1.bf16.msra.mxu0 %v1246_v14  ;;  %1159 = vmatpush1.bf16.msra.mxu1 %v1246_v14 }
  0x72   : > { %483 = vmatprep.subr.bf16.mxu0 %v1247_v15  ;;  %1152 = vmatprep.subr.bf16.mxu1 %v1247_v15 }
  0x75   : > { %484 = vmatpush1.bf16.msra.mxu0 %v1249_v16  ;;  %1160 = vmatpush1.bf16.msra.mxu1 %v1249_v16 }
  0x78   : > { %502 = vmatmul.mubr.bf16.vlgmr.msra.gmra.mrb[0].mxu0 %v1250_v17  ;;  %582 = vmatmul.mubr.bf16.vlgmr.msra.gmra.mrb[0].mxu1 %v1251_v18 }
  0x79   : > { %511 = vmatprep.mubr.bf16.mxu0 %v1402_v0  ;;  %591 = vmatprep.mubr.bf16.mxu1 %v1402_v0 }
  0x80   : > { %512 = vmatmul.mubr.bf16.gmra.mrb[4].mxu0 %v1252_v19  ;;  %592 = vmatmul.mubr.bf16.gmra.mrb[4].mxu1 %v1253_v20 }
  0x81   : > { %521 = vmatprep.mubr.bf16.mxu0 %v1402_v0  ;;  %601 = vmatprep.mubr.bf16.mxu1 %v1402_v0 }
  0x88   : > { %522 = vmatmul.mubr.bf16.gmra.mrb[8].mxu0 %v1254_v21  ;;  %602 = vmatmul.mubr.bf16.gmra.mrb[8].mxu1 %v1255_v22 }
  0x89   : > { %531 = vmatprep.mubr.bf16.mxu0 %v1402_v0  ;;  %611 = vmatprep.mubr.bf16.mxu1 %v1402_v0 }
  0x90   : > { %532 = vmatmul.mubr.bf16.gmra.mrb[12].mxu0 %v1256_v23  ;;  %612 = vmatmul.mubr.bf16.gmra.mrb[12].mxu1 %v1257_v24  ;;  %v1669_v23 = vrot.slane %v710_v4, %v718_v7 }
  0x91   : > { %541 = vmatprep.mubr.bf16.mxu0 %v1402_v0  ;;  %621 = vmatprep.mubr.bf16.mxu1 %v1402_v0 }
  0x98   : > { %542 = vmatmul.mubr.bf16.gmra.mrb[16].mxu0 %v1258_v25  ;;  %622 = vmatmul.mubr.bf16.gmra.mrb[16].mxu1 %v1259_v26 }
  0x99   : > { %551 = vmatprep.mubr.bf16.mxu0 %v1402_v0  ;;  %631 = vmatprep.mubr.bf16.mxu1 %v1402_v0 }
  0xa0   : > { %552 = vmatmul.mubr.bf16.gmra.mrb[20].mxu0 %v1260_v27  ;;  %632 = vmatmul.mubr.bf16.gmra.mrb[20].mxu1 %v1261_v28 }
  0xa1   : > { %561 = vmatprep.mubr.bf16.mxu0 %v1402_v0  ;;  %641 = vmatprep.mubr.bf16.mxu1 %v1402_v0 }
  0xa8   : > { %562 = vmatmul.mubr.bf16.gmra.mrb[24].mxu0 %v1262_v29  ;;  %642 = vmatmul.mubr.bf16.gmra.mrb[24].mxu1 %v1263_v30 }
  0xa9   : > { %571 = vmatprep.mubr.bf16.mxu0 %v1402_v0  ;;  %651 = vmatprep.mubr.bf16.mxu1 %v1402_v0 }
  0xb0   : > { %572 = vmatmul.mubr.bf16.gmra.mrb[28].mxu0 %v1264_v31  ;;  %652 = vmatmul.mubr.bf16.gmra.mrb[28].mxu1 %v1265_v32 }
 0x14b   : > { %v503_v33 = vpop.f32.mrb[0].mxu0  ;;  %v583_v34 = vpop.f32.mrb[0].mxu1 }
 0x14c   : > { %v505_v35 = vpop.f32.mrb[1].mxu0  ;;  %v585_v36 = vpop.f32.mrb[1].mxu1 }
 0x14d   : > { %v507_v37 = vpop.f32.mrb[2].mxu0  ;;  %v587_v38 = vpop.f32.mrb[2].mxu1 }
 0x14e   : > { %v509_v39 = vpop.f32.mrb[3].mxu0  ;;  %v589_v40 = vpop.f32.mrb[3].mxu1 }
 0x153   : > { %v1616_v41 = vpop.f32.mrb[4].mxu0  ;;  %v1618_v42 = vpop.f32.mrb[4].mxu1 }
 0x154   : > { %v1620_v43 = vpop.f32.mrb[5].mxu0  ;;  %v1622_v44 = vpop.f32.mrb[5].mxu1 }
 0x155   : > { %v1624_v45 = vpop.f32.mrb[6].mxu0  ;;  %v1626_v46 = vpop.f32.mrb[6].mxu1 }
 0x156   : > { %v1628_v47 = vpop.f32.mrb[7].mxu0  ;;  %v1630_v48 = vpop.f32.mrb[7].mxu1 }
 0x15b   : > { %v1632_v49 = vpop.f32.mrb[8].mxu0  ;;  %v1634_v50 = vpop.f32.mrb[8].mxu1 }
 0x15c   : > { %v1636_v51 = vpop.f32.mrb[9].mxu0  ;;  %v1638_v52 = vpop.f32.mrb[9].mxu1 }
 0x15d   : > { %v1640_v53 = vpop.f32.mrb[10].mxu0  ;;  %v1642_v54 = vpop.f32.mrb[10].mxu1 }
 0x15e   : > { %v1644_v55 = vpop.f32.mrb[11].mxu0  ;;  %v1646_v56 = vpop.f32.mrb[11].mxu1 }
 0x163   : > { %v1648_v58 = vpop.f32.mrb[12].mxu0  ;;  %v1650_v59 = vpop.f32.mrb[12].mxu1 }
 0x164   : > { %v1652_v60 = vpop.f32.mrb[13].mxu0  ;;  %v1654_v61 = vpop.f32.mrb[13].mxu1 }
 0x165   : > { %v1656_v63 = vpop.f32.mrb[14].mxu0  ;;  %v1658_v0 = vpop.f32.mrb[14].mxu1 }
 0x166   : > { %v1660_v1 = vpop.f32.mrb[15].mxu0  ;;  %v1662_v2 = vpop.f32.mrb[15].mxu1 }
 0x16b   : > { %v543_v5 = vpop.f32.mrb[16].mxu0  ;;  %v623_v6 = vpop.f32.mrb[16].mxu1 }
 0x16c   : > { %v662_v8 = vmax.f32 %v503_v33, %v543_v5  ;;  %v678_v9 = vmax.f32 %v583_v34, %v623_v6  ;;  %v545_v10 = vpop.f32.mrb[17].mxu0  ;;  %v625_v11 = vpop.f32.mrb[17].mxu1 }
 0x16d   : > { %v663_v13 = vmax.f32 %v505_v35, %v545_v10  ;;  %v679_v14 = vmax.f32 %v585_v36, %v625_v11  ;;  %v547_v15 = vpop.f32.mrb[18].mxu0  ;;  %v627_v16 = vpop.f32.mrb[18].mxu1 }
 0x16e   : > { %v664_v17 = vmax.f32 %v507_v37, %v547_v15  ;;  %v680_v18 = vmax.f32 %v587_v38, %v627_v16  ;;  %v549_v19 = vpop.f32.mrb[19].mxu0  ;;  %v629_v20 = vpop.f32.mrb[19].mxu1  ;;  %v694_v21 = vmax.f32 %v662_v8, %v678_v9 }
 0x16f   : > { %v695_v22 = vmax.f32 %v663_v13, %v679_v14  ;;  %v665_v24 = vmax.f32 %v509_v39, %v549_v19  ;;  %v681_v25 = vmax.f32 %v589_v40, %v629_v20 }
 0x170   : > { %v696_v26 = vmax.f32 %v664_v17, %v680_v18  ;;  %v722_v27 = vadd.f32 %v1667_v12, %v694_v21 }
 0x171   : > { %v697_v28 = vmax.f32 %v665_v24, %v681_v25  ;;  %v723_v29 = vadd.f32 %v1669_v23, %v695_v22 }
 0x172   : > { %738 = vxpose.xlu0.b32.start [1/8] (short) %v722_v27, 128  ;;  %v724_v37 = vadd.f32 %v1667_v12, %v696_v26 }
 0x173   : > { %v725_v30 = vadd.f32 %v1669_v23, %v697_v28  ;;  %v553_v31 = vpop.f32.mrb[20].mxu0  ;;  %v633_v32 = vpop.f32.mrb[20].mxu1 }
 0x174   : > { %v666_v33 = vmax.f32 %v1616_v41, %v553_v31  ;;  %v682_v34 = vmax.f32 %v1618_v42, %v633_v32  ;;  %v555_v35 = vpop.f32.mrb[21].mxu0  ;;  %v635_v36 = vpop.f32.mrb[21].mxu1 }
 0x175   : > { %v1125_v38 = vpack.c.bf16 %v725_v30, %v723_v29  ;;  %v667_v39 = vmax.f32 %v1620_v43, %v555_v35  ;;  %v683_v40 = vmax.f32 %v1622_v44, %v635_v36  ;;  %v557_v57 = vpop.f32.mrb[22].mxu0  ;;  %v637_v62 = vpop.f32.mrb[22].mxu1 }
 0x176   : > { %v698_v3 = vmax.f32 %v666_v33, %v682_v34  ;;  %v668_v4 = vmax.f32 %v1624_v45, %v557_v57  ;;  %v684_v5 = vmax.f32 %v1626_v46, %v637_v62  ;;  %v639_v6 = vpop.f32.mrb[23].mxu1  ;;  %739 = vxpose.xlu0.b32.cont [2/8] (short) %v724_v37, 128  ;;  %v559_v41 = vpop.f32.mrb[23].mxu0 }
 0x177   : > { %1126 = vst [vmem:[%s1682_s28] sm:$0xff] %v1125_v38   ;;  %v699_v42 = vmax.f32 %v667_v39, %v683_v40  ;;  %v685_v7 = vmax.f32 %v1630_v48, %v639_v6  ;;  %v669_v43 = vmax.f32 %v1628_v47, %v559_v41 }
 0x178   : > { %v700_v44 = vmax.f32 %v668_v4, %v684_v5  ;;  %v726_v8 = vadd.f32 %v1667_v12, %v698_v3 }
 0x179   : > { %v701_v9 = vmax.f32 %v669_v43, %v685_v7  ;;  %v727_v45 = vadd.f32 %v1669_v23, %v699_v42 }
 0x17a   : > { %740 = vxpose.xlu0.b32.cont [3/8] (short) %v726_v8, 128  ;;  %v728_v47 = vadd.f32 %v1667_v12, %v700_v44 }
 0x17b   : > { %v729_v46 = vadd.f32 %v1669_v23, %v701_v9  ;;  %v563_v10 = vpop.f32.mrb[24].mxu0  ;;  %v643_v11 = vpop.f32.mrb[24].mxu1 }
 0x17c   : > { %v670_v13 = vmax.f32 %v1632_v49, %v563_v10  ;;  %v686_v14 = vmax.f32 %v1634_v50, %v643_v11  ;;  %v565_v15 = vpop.f32.mrb[25].mxu0  ;;  %v645_v48 = vpop.f32.mrb[25].mxu1 }
 0x17d   : > { %v1130_v16 = vpack.c.bf16 %v729_v46, %v727_v45  ;;  %v671_v17 = vmax.f32 %v1636_v51, %v565_v15  ;;  %v687_v18 = vmax.f32 %v1638_v52, %v645_v48  ;;  %v567_v19 = vpop.f32.mrb[26].mxu0  ;;  %v647_v20 = vpop.f32.mrb[26].mxu1 }
 0x17e   : > { %v702_v21 = vmax.f32 %v670_v13, %v686_v14  ;;  %v672_v22 = vmax.f32 %v1640_v53, %v567_v19  ;;  %v688_v24 = vmax.f32 %v1642_v54, %v647_v20  ;;  %v649_v49 = vpop.f32.mrb[27].mxu1  ;;  %741 = vxpose.xlu0.b32.cont [4/8] (short) %v728_v47, 128  ;;  %v569_v25 = vpop.f32.mrb[27].mxu0 }
 0x17f   : > { %1142 = vst [vmem:[%s1682_s28 + $0x8] sm:$0xff] %v1130_v16   ;;  %v703_v50 = vmax.f32 %v671_v17, %v687_v18  ;;  %v689_v26 = vmax.f32 %v1646_v56, %v649_v49  ;;  %v673_v27 = vmax.f32 %v1644_v55, %v569_v25 }
 0x180   : > { %v704_v28 = vmax.f32 %v672_v22, %v688_v24  ;;  %v730_v51 = vadd.f32 %v1667_v12, %v702_v21 }
 0x181   : > { %v705_v52 = vmax.f32 %v673_v27, %v689_v26  ;;  %v731_v29 = vadd.f32 %v1669_v23, %v703_v50 }
 0x182   : > { %742 = vxpose.xlu0.b32.cont [5/8] (short) %v730_v51, 128  ;;  %v732_v55 = vadd.f32 %v1667_v12, %v704_v28 }
 0x183   : > { %v733_v53 = vadd.f32 %v1669_v23, %v705_v52  ;;  %v573_v30 = vpop.f32.mrb[28].mxu0  ;;  %v653_v54 = vpop.f32.mrb[28].mxu1 }
 0x184   : > { %v674_v31 = vmax.f32 %v1648_v58, %v573_v30  ;;  %v690_v32 = vmax.f32 %v1650_v59, %v653_v54  ;;  %v575_v33 = vpop.f32.mrb[29].mxu0  ;;  %v655_v56 = vpop.f32.mrb[29].mxu1 }
 0x185   : > { %v1135_v34 = vpack.c.bf16 %v733_v53, %v731_v29  ;;  %v675_v35 = vmax.f32 %v1652_v60, %v575_v33  ;;  %v691_v36 = vmax.f32 %v1654_v61, %v655_v56  ;;  %v577_v37 = vpop.f32.mrb[30].mxu0  ;;  %v657_v38 = vpop.f32.mrb[30].mxu1 }
 0x186   : > { %v706_v39 = vmax.f32 %v674_v31, %v690_v32  ;;  %v676_v40 = vmax.f32 %v1656_v63, %v577_v37  ;;  %v692_v57 = vmax.f32 %v1658_v0, %v657_v38  ;;  %v659_v58 = vpop.f32.mrb[31].mxu1  ;;  %743 = vxpose.xlu0.b32.cont [6/8] (short) %v732_v55, 128  ;;  %v579_v59 = vpop.f32.mrb[31].mxu0 }
 0x187   : > { %1143 = vst [vmem:[%s1682_s28 + $0x10] sm:$0xff] %v1135_v34   ;;  %v707_v62 = vmax.f32 %v675_v35, %v691_v36  ;;  %v693_v3 = vmax.f32 %v1662_v2, %v659_v58  ;;  %v677_v60 = vmax.f32 %v1660_v1, %v579_v59 }
 0x188   : > { %v708_v61 = vmax.f32 %v676_v40, %v692_v57  ;;  %v734_v4 = vadd.f32 %v1667_v12, %v706_v39 }
 0x189   : > { %v709_v63 = vmax.f32 %v677_v60, %v693_v3  ;;  %v735_v0 = vadd.f32 %v1669_v23, %v707_v62 }
 0x18a   : > { %744 = vxpose.xlu0.b32.cont [7/8] (short) %v734_v4, 128  ;;  %v736_v6 = vadd.f32 %v1667_v12, %v708_v61 }
 0x18b   : > { %v737_v5 = vadd.f32 %v1669_v23, %v709_v63 }
 0x18d   : > { %v1140_v41 = vpack.c.bf16 %v737_v5, %v735_v0 }
 0x18e   : > { %745 = vxpose.xlu0.b32.end [8/8] (short) %v736_v6, 128 }
 0x18f   : > { %1144 = vst [vmem:[%s1682_s28 + $0x18] sm:$0xff] %v1140_v41  }
 0x190   : > { %1337 = shalt.err (!%p1334_p7)
}
 0x191   : > { %s1338_s14 = scalar_lea.hbm %s1725_s7, 512  ;;  %s1342_s23 = scalar_lea.hbm %s1812_s4, 1024 }
 0x192   : > { %p1339_p9 = scmp.ne.s32.totalorder %s1725_s7, %s1338_s14  ;;  %p1343_p5 = scmp.lt.u32.totalorder %s1725_s7, %s1812_s4 }
 0x193   : > { %p1344_p11 = scmp.lt.u32.totalorder %s1342_s23, %s1338_s14  ;;  %p1346_p4 = scmp.lt.u32.totalorder %s1338_s14, %s1725_s7 }
 0x194   : > { %p1340_p2 = pnand %p1339_p9, %p1522_p12 }
 0x195   : > { %p1345_p1 = por %p1344_p11, %p1343_p5 }
 0x196   : > { %p1341_p0 = pneg %p1340_p2 }
 0x197   : > { %p1347_p6 = por %p1346_p4, %p1345_p1 }
 0x199   : > { %p1348_p8 = pnand %p1347_p6, %p1341_p0 }
 0x19b   : > { %1351 = shalt.err (!%p1348_p8)
}
 0x19c   : > { %s1404_s10 = smov 64   ;;  %s1405_s6 = smov 4   ;;  %vm834_vm0 = vcmask 519168  }
 0x19d   : > { %1167 = dma.vmem_to_hbm [thread:$0]  (%p1522_p12), %s1719_s29, 512, %s1725_s7, %s897_s26, %s1404_s10, %s1404_s10, %s1405_s6  }
 0x19e   : > { %p239_p10 = scmp.lt.s32.totalorder %s1452_s19, 1 }
 0x1a0   : > { %s1834_s19 = smov (!%p239_p10, %s1452_s19), 1 }
 0x1a1   : > { %s1096_s5 = sshll.u32 %s1834_s19, 6 }
 0x1a2   : > { %s1756_s11 = scalar_lea.vmem %s1811_s3, %s1096_s5 }
 0x1f2   : > { %v754_v1 = vpop.trf.xlu0 }
 0x1f3   : > { %v1097_v2 = vpack.c.bf16 %v754_v1, %v754_v1 }
 0x1f5   : > { %835 = vst.msk [vmem:[%s1756_s11] sm:$0xf] %vm834_vm0, %v1097_v2 }
 0x1f6   : > { %v755_v12 = vpop.trf.xlu0 }
 0x1f7   : > { %v1098_v23 = vpack.c.bf16 %v755_v12, %v755_v12 }
 0x1f9   : > { %836 = vst.msk [vmem:[%s1756_s11 + $0x4] sm:$0xf] %vm834_vm0, %v1098_v23 }
 0x1fa   : > { %v756_v42 = vpop.trf.xlu0 }
 0x1fb   : > { %v1099_v7 = vpack.c.bf16 %v756_v42, %v756_v42 }
 0x1fd   : > { %837 = vst.msk [vmem:[%s1756_s11 + $0x8] sm:$0xf] %vm834_vm0, %v1099_v7 }
 0x1fe   : > { %v757_v43 = vpop.trf.xlu0 }
 0x1ff   : > { %v1100_v44 = vpack.c.bf16 %v757_v43, %v757_v43 }
 0x201   : > { %838 = vst.msk [vmem:[%s1756_s11 + $0xc] sm:$0xf] %vm834_vm0, %v1100_v44 }
 0x202   : > { %v758_v8 = vpop.trf.xlu0 }
 0x203   : > { %v1101_v9 = vpack.c.bf16 %v758_v8, %v758_v8 }
 0x205   : > { %839 = vst.msk [vmem:[%s1756_s11 + $0x10] sm:$0xf] %vm834_vm0, %v1101_v9 }
 0x206   : > { %v759_v45 = vpop.trf.xlu0 }
 0x207   : > { %v1102_v46 = vpack.c.bf16 %v759_v45, %v759_v45 }
 0x209   : > { %840 = vst.msk [vmem:[%s1756_s11 + $0x14] sm:$0xf] %vm834_vm0, %v1102_v46 }
 0x20a   : > { %v760_v10 = vpop.trf.xlu0 }
 0x20b   : > { %v1103_v11 = vpack.c.bf16 %v760_v10, %v760_v10 }
 0x20d   : > { %841 = vst.msk [vmem:[%s1756_s11 + $0x18] sm:$0xf] %vm834_vm0, %v1103_v11 }
 0x20e   : > { %v761_v13 = vpop.trf.xlu0 }
 0x20f   : > { %v1104_v14 = vpack.c.bf16 %v761_v13, %v761_v13 }
 0x211   : > { %842 = vst.msk [vmem:[%s1756_s11 + $0x1c] sm:$0xf] %vm834_vm0, %v1104_v14 }
 0x212   : > { %v762_v15 = vpop.trf.xlu0 }
 0x213   : > { %v1105_v48 = vpack.c.bf16 %v762_v15, %v762_v15 }
 0x215   : > { %843 = vst.msk [vmem:[%s1756_s11 + $0x20] sm:$0xf] %vm834_vm0, %v1105_v48 }
 0x216   : > { %v763_v47 = vpop.trf.xlu0 }
 0x217   : > { %v1106_v16 = vpack.c.bf16 %v763_v47, %v763_v47 }
 0x219   : > { %844 = vst.msk [vmem:[%s1756_s11 + $0x24] sm:$0xf] %vm834_vm0, %v1106_v16 }
 0x21a   : > { %v764_v17 = vpop.trf.xlu0 }
 0x21b   : > { %v1107_v18 = vpack.c.bf16 %v764_v17, %v764_v17 }
 0x21d   : > { %845 = vst.msk [vmem:[%s1756_s11 + $0x28] sm:$0xf] %vm834_vm0, %v1107_v18 }
 0x21e   : > { %v765_v19 = vpop.trf.xlu0 }
 0x21f   : > { %v1108_v20 = vpack.c.bf16 %v765_v19, %v765_v19 }
 0x221   : > { %846 = vst.msk [vmem:[%s1756_s11 + $0x2c] sm:$0xf] %vm834_vm0, %v1108_v20 }
 0x222   : > { %v766_v21 = vpop.trf.xlu0 }
 0x223   : > { %v1109_v22 = vpack.c.bf16 %v766_v21, %v766_v21 }
 0x225   : > { %847 = vst.msk [vmem:[%s1756_s11 + $0x30] sm:$0xf] %vm834_vm0, %v1109_v22 }
 0x226   : > { %v767_v24 = vpop.trf.xlu0 }
 0x227   : > { %v1110_v49 = vpack.c.bf16 %v767_v24, %v767_v24 }
 0x229   : > { %848 = vst.msk [vmem:[%s1756_s11 + $0x34] sm:$0xf] %vm834_vm0, %v1110_v49 }
 0x22a   : > { %v768_v25 = vpop.trf.xlu0 }
 0x22b   : > { %v1111_v50 = vpack.c.bf16 %v768_v25, %v768_v25 }
 0x22d   : > { %849 = vst.msk [vmem:[%s1756_s11 + $0x38] sm:$0xf] %vm834_vm0, %v1111_v50 }
 0x22e   : > { %v769_v26 = vpop.trf.xlu0 }
 0x22f   : > { %v1112_v27 = vpack.c.bf16 %v769_v26, %v769_v26 }
 0x231   : > { %850 = vst.msk [vmem:[%s1756_s11 + $0x3c] sm:$0xf] %vm834_vm0, %v1112_v27 }
 0x232 PF: > { %s936_s19 = sand.u32 1, %s1382_s15   ;;  %p1827_p12 = scmp.ne.s32.totalorder %s1817_s22, 0 }
 0x233   : > { %p1828_p13 = scmp.ge.s32.totalorder %s1394_s18, 2  ;;  %s937_s30 = scalar_lea.sflag [#allocation4], %s936_s19 }
 0x235   : > { %p1178_p3 = pnand %p1828_p13, %p1827_p12 }
 0x237   : > { %1377 = dma.done.wait (!%p1178_p3), %s937_s30, 512  }
 0x238   : > { %1379 = vsyncadd (!%p1178_p3), %s937_s30, 4294966784  ;;  %p19_p7 = scmp.ge.s32.totalorder %s1487_s27, 4   ;;  %s1829_s15 = smov %s1386_s16 }
 0x239   : > { %s1830_s16 = smov %s1390_s17  ;;  %s1831_s17 = smov %s1518_s24 }
 0x23a   : > { %s1832_s18 = smov %s1487_s27  ;;  %21 = sbr.rel (!%p19_p7) target bundleno = 6 (0x6), region = 93 }
 0x241   :  { %942 = vsyncpa [#allocation3], 1 }
 0x242   :  { %944 = vsyncpa [#allocation3 + $0x1], 1 }
 0x243   :  { %945 = vsyncpa [#allocation6], 1 }
 0x244   :  { %946 = vsyncpa [#allocation4], 1 }
 0x245   :  { %948 = vsyncpa [#allocation4 + $0x1], 1 }

</bundles_post_ra>
